<compile_context>
chip_gen: v6e
topology: v6e:2x2x1
jax: 0.10.0
libtpu: 0.0.40
codegen_flags: <defaults>
</compile_context>

<pallas_src>
import jax
import jax.numpy as jnp
from jax.experimental import pallas as pl
from jax.experimental.pallas import tpu as pltpu

# ----- config (mirrors config.* in the PyTorch code, at small test sizes) -----
IMAGE_SIZE = 16
N_CHANNELS = 4
LAYER_DEPTH = 32          # layerDepth
LATENT_DIM = 8            # config.latent_space_dim
BATCH = 2

IN_DIM = IMAGE_SIZE * IMAGE_SIZE * N_CHANNELS   # 1024

# Lane-padded sizes: every matmul output / store is a full 128-lane slab.
H_PAD = 128               # LAYER_DEPTH padded to one full lane group
L_PAD = 128               # LATENT_DIM  padded to one full lane group

# Batch tiling: multiple of 256 rows for large batches (v6e/v7x MXU height;
# also a multiple of 8 sublanes / 128 for v5e), capped at TM_MAX.
TM_UNIT = 256
TM_MAX = 1024


def _leaky_relu(x, slope=0.2):
    return jnp.where(x > 0, x, slope * x)


def encoder_fc_kernel(x_ref, w1_ref, b1_ref, w2_ref, b2_ref, w3_ref, b3_ref,
                      out_ref):
    """Fused 3-layer MLP on one (tm, IN_DIM) bf16 batch tile.

    Weights have constant block indices -> VMEM-resident across grid steps;
    only x / out stream from / to HBM (double-buffered by BlockSpec).  Dots
    run on the MXU bf16 path with f32 accumulation; biases are [1, 128] f32
    rows broadcast over sublanes.
    """
    x = x_ref[...]                                                # bf16 [tm, IN_DIM]
    h1 = jnp.dot(x, w1_ref[...], preferred_element_type=jnp.float32)
    h1 = _leaky_relu(h1 + b1_ref[...])                            # [tm, H_PAD] f32
    h2 = jnp.dot(h1.astype(jnp.bfloat16), w2_ref[...],
                 preferred_element_type=jnp.float32)
    h2 = _leaky_relu(h2 + b2_ref[...])                            # [tm, H_PAD] f32
    z = jnp.dot(h2.astype(jnp.bfloat16), w3_ref[...],
                preferred_element_type=jnp.float32)
    out_ref[...] = (z + b3_ref[...]).astype(out_ref.dtype)        # [tm, L_PAD] bf16


def init_params(key):
    """f32 params matching PyTorch nn.Linear default init
    U(-1/sqrt(fan_in), 1/sqrt(fan_in)). Weights stored as [in, out]
    (transpose of PyTorch's [out, in]) so the kernel computes x @ W + b."""
    ks = jax.random.split(key, 6)

    def lin(kw, kb, fan_in, fan_out):
        bound = 1.0 / float(fan_in) ** 0.5
        w = jax.random.uniform(kw, (fan_in, fan_out), jnp.float32, -bound, bound)
        b = jax.random.uniform(kb, (1, fan_out), jnp.float32, -bound, bound)
        return w, b

    w1, b1 = lin(ks[0], ks[1], IN_DIM, LAYER_DEPTH)
    w2, b2 = lin(ks[2], ks[3], LAYER_DEPTH, LAYER_DEPTH)
    w3, b3 = lin(ks[4], ks[5], LAYER_DEPTH, LATENT_DIM)
    return (w1, b1, w2, b2, w3, b3)


def pack_params(params):
    """Zero-pad hidden/latent dims to 128 lanes; cast weights to bf16.

    Padded columns produce exactly 0 (bias 0 -> LeakyReLU(0)=0) and the
    corresponding zero rows of the next weight contribute nothing, so the
    padded network matches the original on the real 32/8 columns.  Biases
    stay f32 (added after f32 accumulation)."""
    w1, b1, w2, b2, w3, b3 = params

    def pad(a, rows, cols):
        return jnp.pad(a, ((0, rows - a.shape[0]), (0, cols - a.shape[1])))

    w1p = pad(w1, IN_DIM, H_PAD).astype(jnp.bfloat16)
    w2p = pad(w2, H_PAD, H_PAD).astype(jnp.bfloat16)
    w3p = pad(w3, H_PAD, L_PAD).astype(jnp.bfloat16)
    b1p = pad(b1, 1, H_PAD)
    b2p = pad(b2, 1, H_PAD)
    b3p = pad(b3, 1, L_PAD)
    return (w1p, b1p, w2p, b2p, w3p, b3p)


def _choose_tile(B):
    """Pick (tile_rows, grid_steps) without materializing a padded copy of x."""
    if B < 2 * TM_UNIT:
        # Small batch: one tile whose block dims equal the array dims
        # (no (8,128) divisibility requirement, no padding, no partial blocks).
        return B, 1
    # Large batch: multiple of 256 rows, capped at TM_MAX, and capped at ~B/2
    # so the parallel batch grid has >= 2 steps (v7x: both TensorCores used).
    tm = min(TM_MAX, max(TM_UNIT, (B // 2) // TM_UNIT * TM_UNIT))
    return tm, pl.cdiv(B, tm)   # last tile may be partial; Pallas clips the DMAs


@jax.jit
def encoder_fc_forward(x_nchw, packed_params):
    """x_nchw: [B, C, H, W] f32 -> [B, LATENT_DIM, 1, 1] f32."""
    w1, b1, w2, b2, w3, b3 = packed_params
    B = x_nchw.shape[0]

    # nn.Flatten (row-major) + cast to bf16.  allow_input_fusion on operand 0
    # lets XLA fuse this elementwise convert into the pallas_call input stream
    # so x is read from HBM once, in bf16 (no standalone convert pass).
    x_flat = x_nchw.reshape(B, -1).astype(jnp.bfloat16)

    tm, steps = _choose_tile(B)
    grid = (steps,)

    flops = 2 * B * (IN_DIM * H_PAD + H_PAD * H_PAD + H_PAD * L_PAD)
    bytes_accessed = (B * IN_DIM * 2                      # bf16 activations
                      + (w1.size + w2.size + w3.size) * 2  # bf16 weights
                      + (b1.size + b2.size + b3.size) * 4  # f32 biases
                      + B * L_PAD * 2)                     # bf16 output slab

    const = lambda i: (0, 0)
    z = pl.pallas_call(
        encoder_fc_kernel,
        out_shape=jax.ShapeDtypeStruct((B, L_PAD), jnp.bfloat16),
        grid=grid,
        in_specs=[
            pl.BlockSpec((tm, IN_DIM), lambda i: (i, 0)),   # x: streamed
            pl.BlockSpec((IN_DIM, H_PAD), const),           # w1: resident
            pl.BlockSpec((1, H_PAD), const),                # b1
            pl.BlockSpec((H_PAD, H_PAD), const),            # w2
            pl.BlockSpec((1, H_PAD), const),                # b2
            pl.BlockSpec((H_PAD, L_PAD), const),            # w3
            pl.BlockSpec((1, L_PAD), const),                # b3
        ],
        out_specs=pl.BlockSpec((tm, L_PAD), lambda i: (i, 0)),  # lane-dense bf16
        compiler_params=pltpu.CompilerParams(
            dimension_semantics=("parallel",),   # v7x: batch split across 2 TCs
            allow_input_fusion=[True, False, False, False, False, False, False]),
        cost_estimate=pl.CostEstimate(
            flops=flops, transcendentals=0, bytes_accessed=bytes_accessed),
    )(x_flat, w1, b1, w2, b2, w3, b3)

    # Slice back to real latent width; nn.Unflatten(1, (latent, 1, 1)).
    return z[:, :LATENT_DIM].astype(jnp.float32).reshape(B, LATENT_DIM, 1, 1)


def reference_forward(x_nchw, params):
    """Pure-JAX f32 reference of the PyTorch module forward."""
    w1, b1, w2, b2, w3, b3 = params
    x = x_nchw.reshape(x_nchw.shape[0], -1)
    h1 = _leaky_relu(x @ w1 + b1)
    h2 = _leaky_relu(h1 @ w2 + b2)
    z = h2 @ w3 + b3
    return z.reshape(x_nchw.shape[0], LATENT_DIM, 1, 1)


def reference_forward_bf16(x_nchw, packed_params):
    """Mirror of the kernel arithmetic: bf16 inputs/weights, f32 accumulation,
    bf16 output round-trip."""
    w1, b1, w2, b2, w3, b3 = packed_params
    x = x_nchw.reshape(x_nchw.shape[0], -1).astype(jnp.bfloat16)
    h1 = _leaky_relu(jnp.dot(x, w1, preferred_element_type=jnp.float32) + b1)
    h2 = _leaky_relu(jnp.dot(h1.astype(jnp.bfloat16), w2,
                             preferred_element_type=jnp.float32) + b2)
    z = jnp.dot(h2.astype(jnp.bfloat16), w3,
                preferred_element_type=jnp.float32) + b3
    z = z.astype(jnp.bfloat16).astype(jnp.float32)
    return z[:, :LATENT_DIM].reshape(x_nchw.shape[0], LATENT_DIM, 1, 1)


if __name__ == "__main__":
    key = jax.random.PRNGKey(0)
    k_x, k_p = jax.random.split(key)

    x = jax.random.normal(k_x, (BATCH, N_CHANNELS, IMAGE_SIZE, IMAGE_SIZE),
                          dtype=jnp.float32)
    params = init_params(k_p)
    packed = pack_params(params)

    out = jax.block_until_ready(encoder_fc_forward(x, packed))
    assert out.shape == (BATCH, LATENT_DIM, 1, 1)

    # Tight check vs a reference mirroring the kernel's bf16 arithmetic.
    ref_bf16 = reference_forward_bf16(x, packed)
    assert jnp.allclose(out, ref_bf16, atol=1e-2, rtol=1e-2)

    # Loose check vs exact f32 module semantics (only bf16 rounding differs).
    ref_f32 = reference_forward(x, params)
    assert jnp.allclose(out, ref_f32, atol=3e-2, rtol=3e-2)

    print("KERNEL_OK")
</pallas_src>

<mosaic_0001>
module attributes {stable_mosaic.version = 11 : i64} {
  func.func @encoder_fc_kernel(%arg0: i32, %arg1: memref<2x1024xbf16, #tpu.memory_space<vmem>>, %arg2: memref<1024x128xbf16, #tpu.memory_space<vmem>>, %arg3: memref<1x128xf32, #tpu.memory_space<vmem>>, %arg4: memref<128x128xbf16, #tpu.memory_space<vmem>>, %arg5: memref<1x128xf32, #tpu.memory_space<vmem>>, %arg6: memref<128x128xbf16, #tpu.memory_space<vmem>>, %arg7: memref<1x128xf32, #tpu.memory_space<vmem>>, %arg8: memref<2x128xbf16, #tpu.memory_space<vmem>>) attributes {dimension_semantics = [#tpu.dimension_semantics<parallel>], iteration_bounds = array<i64: 1>, scalar_prefetch = 0 : i64, scratch_operands = 0 : i64, tpu.core_type = #tpu.core_type<tc>, window_params = [{transform_indices = @transform_0, window_bounds = array<i64: 2, 1024>}, {pipeline_mode = #tpu.pipeline_mode<synchronous>, transform_indices = @transform_1, window_bounds = array<i64: 1024, 128>}, {pipeline_mode = #tpu.pipeline_mode<synchronous>, transform_indices = @transform_2, window_bounds = array<i64: 1, 128>}, {pipeline_mode = #tpu.pipeline_mode<synchronous>, transform_indices = @transform_3, window_bounds = array<i64: 128, 128>}, {pipeline_mode = #tpu.pipeline_mode<synchronous>, transform_indices = @transform_4, window_bounds = array<i64: 1, 128>}, {pipeline_mode = #tpu.pipeline_mode<synchronous>, transform_indices = @transform_5, window_bounds = array<i64: 128, 128>}, {pipeline_mode = #tpu.pipeline_mode<synchronous>, transform_indices = @transform_6, window_bounds = array<i64: 1, 128>}, {transform_indices = @transform_7, window_bounds = array<i64: 2, 128>}]} {
    %c0 = arith.constant 0 : index
    %c0_0 = arith.constant 0 : index
    %0 = vector.load %arg1[%c0, %c0_0] : memref<2x1024xbf16, #tpu.memory_space<vmem>>, vector<2x1024xbf16>
    %c0_1 = arith.constant 0 : index
    %c0_2 = arith.constant 0 : index
    %1 = vector.load %arg2[%c0_1, %c0_2] : memref<1024x128xbf16, #tpu.memory_space<vmem>>, vector<1024x128xbf16>
    %cst = arith.constant dense<0.000000e+00> : vector<2x128xf32>
    %2 = tpu.matmul %0, %1, %cst {dimension_numbers = #tpu.dot_dimension_numbers<[1], [0], [0], [1], [0, 0, 1, 1], [], []>} : vector<2x1024xbf16>, vector<1024x128xbf16>, vector<2x128xf32> -> vector<2x128xf32>
    %c0_3 = arith.constant 0 : index
    %c0_4 = arith.constant 0 : index
    %3 = vector.load %arg3[%c0_3, %c0_4] : memref<1x128xf32, #tpu.memory_space<vmem>>, vector<1x128xf32>
    %4 = vector.broadcast %3 : vector<1x128xf32> to vector<2x128xf32>
    %5 = arith.addf %2, %4 : vector<2x128xf32>
    %cst_5 = arith.constant 0.000000e+00 : f32
    %6 = vector.broadcast %cst_5 : f32 to vector<2x128xf32>
    %7 = arith.cmpf ogt, %5, %6 : vector<2x128xf32>
    %cst_6 = arith.constant 2.000000e-01 : f32
    %8 = vector.broadcast %cst_6 : f32 to vector<2x128xf32>
    %9 = arith.mulf %8, %5 : vector<2x128xf32>
    %10 = arith.select %7, %5, %9 : vector<2x128xi1>, vector<2x128xf32>
    %11 = arith.truncf %10 : vector<2x128xf32> to vector<2x128xbf16>
    %c0_7 = arith.constant 0 : index
    %c0_8 = arith.constant 0 : index
    %12 = vector.load %arg4[%c0_7, %c0_8] : memref<128x128xbf16, #tpu.memory_space<vmem>>, vector<128x128xbf16>
    %cst_9 = arith.constant dense<0.000000e+00> : vector<2x128xf32>
    %13 = tpu.matmul %11, %12, %cst_9 {dimension_numbers = #tpu.dot_dimension_numbers<[1], [0], [0], [1], [0, 0, 1, 1], [], []>} : vector<2x128xbf16>, vector<128x128xbf16>, vector<2x128xf32> -> vector<2x128xf32>
    %c0_10 = arith.constant 0 : index
    %c0_11 = arith.constant 0 : index
    %14 = vector.load %arg5[%c0_10, %c0_11] : memref<1x128xf32, #tpu.memory_space<vmem>>, vector<1x128xf32>
    %15 = vector.broadcast %14 : vector<1x128xf32> to vector<2x128xf32>
    %16 = arith.addf %13, %15 : vector<2x128xf32>
    %cst_12 = arith.constant 0.000000e+00 : f32
    %17 = vector.broadcast %cst_12 : f32 to vector<2x128xf32>
    %18 = arith.cmpf ogt, %16, %17 : vector<2x128xf32>
    %cst_13 = arith.constant 2.000000e-01 : f32
    %19 = vector.broadcast %cst_13 : f32 to vector<2x128xf32>
    %20 = arith.mulf %19, %16 : vector<2x128xf32>
    %21 = arith.select %18, %16, %20 : vector<2x128xi1>, vector<2x128xf32>
    %22 = arith.truncf %21 : vector<2x128xf32> to vector<2x128xbf16>
    %c0_14 = arith.constant 0 : index
    %c0_15 = arith.constant 0 : index
    %23 = vector.load %arg6[%c0_14, %c0_15] : memref<128x128xbf16, #tpu.memory_space<vmem>>, vector<128x128xbf16>
    %cst_16 = arith.constant dense<0.000000e+00> : vector<2x128xf32>
    %24 = tpu.matmul %22, %23, %cst_16 {dimension_numbers = #tpu.dot_dimension_numbers<[1], [0], [0], [1], [0, 0, 1, 1], [], []>} : vector<2x128xbf16>, vector<128x128xbf16>, vector<2x128xf32> -> vector<2x128xf32>
    %c0_17 = arith.constant 0 : index
    %c0_18 = arith.constant 0 : index
    %25 = vector.load %arg7[%c0_17, %c0_18] : memref<1x128xf32, #tpu.memory_space<vmem>>, vector<1x128xf32>
    %26 = vector.broadcast %25 : vector<1x128xf32> to vector<2x128xf32>
    %27 = arith.addf %24, %26 : vector<2x128xf32>
    %28 = arith.truncf %27 : vector<2x128xf32> to vector<2x128xbf16>
    %c0_19 = arith.constant 0 : index
    %c0_20 = arith.constant 0 : index
    %29 = vector.load %arg8[%c0_19, %c0_20] : memref<2x128xbf16, #tpu.memory_space<vmem>>, vector<2x128xbf16>
    tpu.vector_store %arg8[%c0_19, %c0_20], %28 {strides = array<i32>} : memref<2x128xbf16, #tpu.memory_space<vmem>>, vector<2x128xbf16>,
    return
  }
  func.func @transform_0(%arg0: i32) -> (i32, i32) {
    %c0_i32 = arith.constant 0 : i32
    %c0_i32_0 = arith.constant 0 : i32
    return %arg0, %c0_i32 : i32, i32
  }
  func.func @transform_1(%arg0: i32) -> (i32, i32) {
    %c0_i32 = arith.constant 0 : i32
    %c0_i32_0 = arith.constant 0 : i32
    %c0_i32_1 = arith.constant 0 : i32
    return %c0_i32, %c0_i32_0 : i32, i32
  }
  func.func @transform_2(%arg0: i32) -> (i32, i32) {
    %c0_i32 = arith.constant 0 : i32
    %c0_i32_0 = arith.constant 0 : i32
    %c0_i32_1 = arith.constant 0 : i32
    return %c0_i32, %c0_i32_0 : i32, i32
  }
  func.func @transform_3(%arg0: i32) -> (i32, i32) {
    %c0_i32 = arith.constant 0 : i32
    %c0_i32_0 = arith.constant 0 : i32
    %c0_i32_1 = arith.constant 0 : i32
    return %c0_i32, %c0_i32_0 : i32, i32
  }
  func.func @transform_4(%arg0: i32) -> (i32, i32) {
    %c0_i32 = arith.constant 0 : i32
    %c0_i32_0 = arith.constant 0 : i32
    %c0_i32_1 = arith.constant 0 : i32
    return %c0_i32, %c0_i32_0 : i32, i32
  }
  func.func @transform_5(%arg0: i32) -> (i32, i32) {
    %c0_i32 = arith.constant 0 : i32
    %c0_i32_0 = arith.constant 0 : i32
    %c0_i32_1 = arith.constant 0 : i32
    return %c0_i32, %c0_i32_0 : i32, i32
  }
  func.func @transform_6(%arg0: i32) -> (i32, i32) {
    %c0_i32 = arith.constant 0 : i32
    %c0_i32_0 = arith.constant 0 : i32
    %c0_i32_1 = arith.constant 0 : i32
    return %c0_i32, %c0_i32_0 : i32, i32
  }
  func.func @transform_7(%arg0: i32) -> (i32, i32) {
    %c0_i32 = arith.constant 0 : i32
    %c0_i32_0 = arith.constant 0 : i32
    return %arg0, %c0_i32 : i32, i32
  }
}

</mosaic_0001>

<bundles_post_ra>
// kernel: encoder_fc_forward.1
= control target key start
LH: loop header
LB: loop body
LE: loop exit
PB: predicated region body
PF: predicated region fallthrough
CT: control target
= control target key end

     0   :  { %12 = vsyncpa [#allocation3], 0  ;;  %s1354_s24 = smov [#allocation2]   ;;  %s1497_s0 = inlined_call_operand.vmem [shape: bf16[2,1024], index: 0, kind: input, shape index: {}]   ;;  %s1498_s1 = inlined_call_operand.hbm [shape: bf16[1024,128], index: 1, kind: input, shape index: {}]   ;;  %s1499_s2 = inlined_call_operand.vmem [shape: f32[1,128], index: 2, kind: input, shape index: {}]   ;;  %s1500_s3 = inlined_call_operand.vmem [shape: bf16[128,128], index: 3, kind: input, shape index: {}]   ;;  %s1501_s4 = inlined_call_operand.vmem [shape: f32[1,128], index: 4, kind: input, shape index: {}]   ;;  %s1502_s5 = inlined_call_operand.vmem [shape: bf16[128,128], index: 5, kind: input, shape index: {}]   ;;  %s1503_s6 = inlined_call_operand.vmem [shape: f32[1,128], index: 6, kind: input, shape index: {}]   ;;  %s1504_s7 = inlined_call_operand.vmem [shape: bf16[2,128], index: 7, kind: output, shape index: {}]  }
   0x1   :  { %s20_s25 = sshll.u32 %s1354_s24, 4  ;;  %s21_s25 = int_to_ptr.vmem [resolvable:$true] %s20_s25 }
   0x2   :  { %s1340_s26 = scalar_lea.vmem %s21_s25, 8192  ;;  %p1345_p1 = scmp.lt.s32.totalorder %s21_s25, %s21_s25 }
   0x3   :  { %p1341_p0 = scmp.ne.s32.totalorder %s21_s25, %s1340_s26  ;;  %p1346_p2 = scmp.lt.s32.totalorder %s1340_s26, %s1340_s26 }
   0x5   :  { %p1347_p3 = por %p1346_p2, %p1345_p1 }
   0x7   :  { %p1348_p4 = pnand %p1347_p3, %p1341_p0 }
   0x9   :  { %1351 = shalt.err (!%p1348_p4)
}
   0xa   :  { %s1355_s27 = smov 64   ;;  %s1356_s28 = smov 4  }
   0xb   :  { %26 = dma.hbm_to_vmem [thread:$0]  %s1498_s1, 8192, %s21_s25, [#allocation3], %s1355_s27, %s1355_s27, %s1356_s28  }
   0xc   :  { %1352 = dma.done.wait [#allocation3], 8192  }
   0xd   :  { %1353 = vsyncadd [#allocation3], 4294959104  ;;  %v1251_v0 = vld [vmem:[#allocation2 + $0x78] sm:$0xff]   ;;  %v1255_v4 = vld [vmem:[#allocation2 + $0x70] sm:$0xff]   ;;  %v1357_v22 = vmov 1966171168   ;;  %v182_v24 = vlaneseq }
   0xe   :  { %v1252_v1 = vld [vmem:[#allocation2 + $0xf8] sm:$0xff]   ;;  %1099 = vmatprep.subr.bf16.mxu0 %v1251_v0  ;;  %v1256_v5 = vld [vmem:[#allocation2 + $0xf0] sm:$0xff]   ;;  %v1259_v8 = vld [vmem:[#allocation2 + $0x68] sm:$0xff]   ;;  %v180_v23 = vunpack.c.l.s4 %v1357_v22  ;;  %vm1359_vm0 = vmmov 0  }
   0xf   :  { %v1253_v2 = vld [vmem:[#allocation2 + $0x38] sm:$0xff]   ;;  %1121 = vmatprep.subr.bf16.mxu1 %v1252_v1  ;;  %v1257_v6 = vld [vmem:[#allocation2 + $0x30] sm:$0xff]   ;;  %v1260_v9 = vld [vmem:[#allocation2 + $0xe8] sm:$0xff]   ;;  %v183_v30 = vshrl.u32 %v182_v24, 7 }
  0x10   :  { %v1254_v3 = vld [vmem:[#allocation2 + $0xb8] sm:$0xff]   ;;  %1100 = vmatpush3.bf16.msra.mxu0 %v1253_v2  ;;  %v1258_v7 = vld [vmem:[#allocation2 + $0xb0] sm:$0xff]   ;;  %v1261_v10 = vld [vmem:[#allocation2 + $0x28] sm:$0xff]   ;;  %v181_v29 = vunpack.c.0.s8 %v180_v23 }
  0x11   :  { %1122 = vmatpush3.bf16.msra.mxu1 %v1254_v3  ;;  %1101 = vmatprep.subr.bf16.mxu0 %v1255_v4  ;;  %v1262_v11 = vld [vmem:[#allocation2 + $0xa8] sm:$0xff]   ;;  %v1263_v12 = vld [vmem:[#allocation2 + $0x60] sm:$0xff]   ;;  %v1267_v16 = vld [vmem:[#allocation2 + $0x58] sm:$0xff]  }
  0x12   :  { %1123 = vmatprep.subr.bf16.mxu1 %v1256_v5  ;;  %v1264_v13 = vld [vmem:[#allocation2 + $0xe0] sm:$0xff]   ;;  %v1268_v17 = vld [vmem:[#allocation2 + $0xd8] sm:$0xff]   ;;  %v1271_v20 = vld [vmem:[#allocation2 + $0x50] sm:$0xff]   ;;  %v1403_v35 = vsub.s32 %v181_v29, %v183_v30 }
  0x13   :  { %v1265_v14 = vld [vmem:[#allocation2 + $0x20] sm:$0xff]   ;;  %v1269_v18 = vld [vmem:[#allocation2 + $0x18] sm:$0xff]   ;;  %v1272_v21 = vld [vmem:[#allocation2 + $0xd0] sm:$0xff]  }
  0x14   :  { %1102 = vmatpush3.bf16.msra.mxu0 %v1257_v6  ;;  %v1266_v15 = vld [vmem:[#allocation2 + $0xa0] sm:$0xff]   ;;  %v1270_v19 = vld [vmem:[#allocation2 + $0x98] sm:$0xff]   ;;  %v1273_v25 = vld [vmem:[#allocation2 + $0x10] sm:$0xff]  }
  0x15   :  { %1124 = vmatpush3.bf16.msra.mxu1 %v1258_v7  ;;  %1103 = vmatprep.subr.bf16.mxu0 %v1259_v8  ;;  %v1274_v26 = vld [vmem:[#allocation2 + $0x90] sm:$0xff]   ;;  %v1275_v27 = vld [vmem:[#allocation2 + $0x48] sm:$0xff]   ;;  %v1279_v33 = vld [vmem:[#allocation2 + $0x40] sm:$0xff]  }
  0x16   :  { %1125 = vmatprep.subr.bf16.mxu1 %v1260_v9  ;;  %v1276_v28 = vld [vmem:[#allocation2 + $0xc8] sm:$0xff]   ;;  %v1280_v34 = vld [vmem:[#allocation2 + $0xc0] sm:$0xff]   ;;  %v1284_v41 = vld [vmem:[#allocation2 + $0x178] sm:$0xff]  }
  0x17   :  { %v1277_v31 = vld [vmem:[#allocation2 + $0x8] sm:$0xff]   ;;  %v1281_v36 = vld [vmem:[#allocation2] sm:$0xff]   ;;  %v1285_v42 = vld [vmem:[#allocation2 + $0x1f8] sm:$0xff]  }
  0x18   :  { %1104 = vmatpush3.bf16.msra.mxu0 %v1261_v10  ;;  %v1278_v32 = vld [vmem:[#allocation2 + $0x88] sm:$0xff]   ;;  %v1282_v37 = vld [vmem:[#allocation2 + $0x80] sm:$0xff]   ;;  %v1286_v46 = vld [vmem:[#allocation2 + $0x138] sm:$0xff]  }
  0x19   :  { %1126 = vmatpush3.bf16.msra.mxu1 %v1262_v11  ;;  %1105 = vmatprep.subr.bf16.mxu0 %v1263_v12  ;;  %v41_v38 = vld [vmem:[%s1497_s0] sm:$0xff]  ;;  %v1287_v48 = vld [vmem:[#allocation2 + $0x1b8] sm:$0xff]   ;;  %v1288_v51 = vld [vmem:[#allocation2 + $0x170] sm:$0xff]  }
  0x1a   :  { %1127 = vmatprep.subr.bf16.mxu1 %v1264_v13  ;;  %v178_v39 = vcombine.high %v41_v38, %v41_v38  ;;  %v185_v40 = vrot.slane %v41_v38, %v1403_v35  ;;  %v1289_v53 = vld [vmem:[#allocation2 + $0x1f0] sm:$0xff]   ;;  %v1292_v58 = vld [vmem:[#allocation2 + $0x168] sm:$0xff]   ;;  %v1296_v62 = vld [vmem:[#allocation2 + $0x160] sm:$0xff]  }
  0x1b   :  { %v1290_v55 = vld [vmem:[#allocation2 + $0x130] sm:$0xff]   ;;  %v1293_v59 = vld [vmem:[#allocation2 + $0x1e8] sm:$0xff]   ;;  %v1297_v63 = vld [vmem:[#allocation2 + $0x1e0] sm:$0xff]  }
  0x1c   :  { %1106 = vmatpush3.bf16.msra.mxu0 %v1265_v14  ;;  %v193_v43 = vcombine.high %v185_v40, %v185_v40  ;;  %v201_v44 = vrot.slane %v185_v40, %v1403_v35  ;;  %v1411_v45 = vrot.slane %v178_v39, %v1403_v35  ;;  %v1291_v56 = vld [vmem:[#allocation2 + $0x1b0] sm:$0xff]   ;;  %v1294_v60 = vld [vmem:[#allocation2 + $0x128] sm:$0xff]   ;;  %v1298_v0 = vld [vmem:[#allocation2 + $0x120] sm:$0xff]  }
  0x1d   :  { %1128 = vmatpush3.bf16.msra.mxu1 %v1266_v15  ;;  %1107 = vmatprep.subr.bf16.mxu0 %v1267_v16  ;;  %v1295_v61 = vld [vmem:[#allocation2 + $0x1a8] sm:$0xff]   ;;  %v1299_v1 = vld [vmem:[#allocation2 + $0x1a0] sm:$0xff]   ;;  %v1300_v2 = vld [vmem:[#allocation2 + $0x158] sm:$0xff]  }
  0x1e   :  { %1129 = vmatprep.subr.bf16.mxu1 %v1268_v17  ;;  %v215_v47 = vrot.slane %v193_v43, %v1403_v35  ;;  %v194_v49 = vcombine.high %v1411_v45, %v1411_v45  ;;  %v223_v50 = vcombine.high %v201_v44, %v201_v44  ;;  %v1301_v3 = vld [vmem:[#allocation2 + $0x1d8] sm:$0xff]   ;;  %v1304_v6 = vld [vmem:[#allocation2 + $0x150] sm:$0xff]   ;;  %v1308_v10 = vld [vmem:[#allocation2 + $0x148] sm:$0xff]  }
  0x1f   :  { %v1302_v4 = vld [vmem:[#allocation2 + $0x118] sm:$0xff]   ;;  %v1305_v7 = vld [vmem:[#allocation2 + $0x1d0] sm:$0xff]   ;;  %v1309_v11 = vld [vmem:[#allocation2 + $0x1c8] sm:$0xff]  }
  0x20   :  { %1108 = vmatpush3.bf16.msra.mxu0 %v1269_v18  ;;  %651 = vmatprep.mubr.bf16.mxu0 %v215_v47  ;;  %v225_v52 = vcombine.high %v215_v47, %v215_v47  ;;  %v222_v54 = vrot.slane %v194_v49, %v1403_v35  ;;  %v1303_v5 = vld [vmem:[#allocation2 + $0x198] sm:$0xff]   ;;  %v1306_v8 = vld [vmem:[#allocation2 + $0x110] sm:$0xff]   ;;  %v1310_v12 = vld [vmem:[#allocation2 + $0x108] sm:$0xff]   ;;  %v208_v18 = vrot.slane %v1411_v45, %v1403_v35 }
  0x21   :  { %1130 = vmatpush3.bf16.msra.mxu1 %v1270_v19  ;;  %1109 = vmatprep.subr.bf16.mxu0 %v1271_v20  ;;  %v1307_v9 = vld [vmem:[#allocation2 + $0x190] sm:$0xff]   ;;  %v1311_v13 = vld [vmem:[#allocation2 + $0x188] sm:$0xff]   ;;  %v1312_v14 = vld [vmem:[#allocation2 + $0x140] sm:$0xff]  }
  0x22   :  { %1131 = vmatprep.subr.bf16.mxu1 %v1272_v21  ;;  %691 = vmatprep.mubr.bf16.mxu1 %v225_v52  ;;  %v226_v57 = vcombine.high %v222_v54, %v222_v54  ;;  %v1313_v15 = vld [vmem:[#allocation2 + $0x1c0] sm:$0xff]   ;;  %v224_v19 = vcombine.high %v208_v18, %v208_v18  ;;  %v1316_v20 = vld [vmem:[%s1500_s3 + $0x38] sm:$0xff]   ;;  %v1358_v21 = vmov 0.0   ;;  %v1317_v22 = vld [vmem:[%s1500_s3 + $0x30] sm:$0xff]  }
  0x23   :  { %v1314_v16 = vld [vmem:[#allocation2 + $0x100] sm:$0xff]   ;;  %v1318_v23 = vld [vmem:[%s1500_s3 + $0x28] sm:$0xff]   ;;  %v1324_v29 = vld [vmem:[%s1502_s5 + $0x38] sm:$0xff]  }
  0x24   :  { %1110 = vmatpush3.bf16.msra.mxu0 %v1273_v25  ;;  %v1315_v17 = vld [vmem:[#allocation2 + $0x180] sm:$0xff]   ;;  %v1320_v25 = vld [vmem:[%s1500_s3 + $0x18] sm:$0xff]   ;;  %v1325_v30 = vld [vmem:[%s1502_s5 + $0x30] sm:$0xff]  }
  0x25   :  { %1132 = vmatpush3.bf16.msra.mxu1 %v1274_v26  ;;  %1111 = vmatprep.subr.bf16.mxu0 %v1275_v27  ;;  %v1319_v24 = vld [vmem:[%s1500_s3 + $0x20] sm:$0xff]   ;;  %v1321_v26 = vld [vmem:[%s1500_s3 + $0x10] sm:$0xff]   ;;  %v1322_v27 = vld [vmem:[%s1500_s3 + $0x8] sm:$0xff]  }
  0x26   :  { %1133 = vmatprep.subr.bf16.mxu1 %v1276_v28  ;;  %v1323_v28 = vld [vmem:[%s1500_s3] sm:$0xff]  }
  0x28   :  { %1112 = vmatpush3.bf16.msra.mxu0 %v1277_v31  ;;  %v1326_v31 = vld [vmem:[%s1502_s5 + $0x28] sm:$0xff]  }
  0x29   :  { %1134 = vmatpush3.bf16.msra.mxu1 %v1278_v32  ;;  %1113 = vmatprep.subr.bf16.mxu0 %v1279_v33  ;;  %v1327_v32 = vld [vmem:[%s1502_s5 + $0x20] sm:$0xff]   ;;  %v1328_v33 = vld [vmem:[%s1502_s5 + $0x18] sm:$0xff]  }
  0x2a   :  { %1135 = vmatprep.subr.bf16.mxu1 %v1280_v34  ;;  %v1329_v34 = vld [vmem:[%s1502_s5 + $0x10] sm:$0xff]  }
  0x2c   :  { %1114 = vmatpush3.bf16.msra.mxu0 %v1281_v36 }
  0x2d   :  { %1136 = vmatpush3.bf16.msra.mxu1 %v1282_v37  ;;  %1143 = vmatprep.subr.bf16.mxu0 %v1284_v41 }
  0x2e   :  { %1165 = vmatprep.subr.bf16.mxu1 %v1285_v42 }
  0x2f   :  { %652 = vmatmul.mubr.bf16.vlgmr.msra.gmra.mxu0 %v201_v44  ;;  %v1016_v44 = vld [vmem:[%s1499_s2] ss:$0 sm:$0xff] }
  0x30   :  { %1144 = vmatpush3.bf16.msra.mxu0 %v1286_v46  ;;  %692 = vmatmul.mubr.bf16.vlgmr.msra.gmra.mxu1 %v223_v50 }
  0x31   :  { %1145 = vmatprep.subr.bf16.mxu0 %v1288_v51  ;;  %1166 = vmatpush3.bf16.msra.mxu1 %v1287_v48 }
  0x32   :  { %731 = vmatprep.mubr.bf16.mxu0 %v222_v54  ;;  %1167 = vmatprep.subr.bf16.mxu1 %v1289_v53 }
  0x33   :  { %771 = vmatprep.mubr.bf16.mxu1 %v226_v57 }
  0x34   :  { %1146 = vmatpush3.bf16.msra.mxu0 %v1290_v55 }
  0x35   :  { %1147 = vmatprep.subr.bf16.mxu0 %v1292_v58  ;;  %1168 = vmatpush3.bf16.msra.mxu1 %v1291_v56 }
  0x36   :  { %1169 = vmatprep.subr.bf16.mxu1 %v1293_v59 }
  0x38   :  { %1148 = vmatpush3.bf16.msra.mxu0 %v1294_v60 }
  0x39   :  { %1149 = vmatprep.subr.bf16.mxu0 %v1296_v62  ;;  %1170 = vmatpush3.bf16.msra.mxu1 %v1295_v61 }
  0x3a   :  { %1171 = vmatprep.subr.bf16.mxu1 %v1297_v63  ;;  %v1330_v63 = vld [vmem:[%s1502_s5 + $0x8] sm:$0xff]  }
  0x3c   :  { %1150 = vmatpush3.bf16.msra.mxu0 %v1298_v0  ;;  %v1331_v0 = vld [vmem:[%s1502_s5] sm:$0xff]  }
  0x3d   :  { %1151 = vmatprep.subr.bf16.mxu0 %v1300_v2  ;;  %1172 = vmatpush3.bf16.msra.mxu1 %v1299_v1  ;;  %v1081_v1 = vld [vmem:[%s1501_s4] ss:$0 sm:$0xff] }
  0x3e   :  { %1173 = vmatprep.subr.bf16.mxu1 %v1301_v3 }
  0x40   :  { %1152 = vmatpush3.bf16.msra.mxu0 %v1302_v4 }
  0x41   :  { %1153 = vmatprep.subr.bf16.mxu0 %v1304_v6  ;;  %1174 = vmatpush3.bf16.msra.mxu1 %v1303_v5 }
  0x42   :  { %1175 = vmatprep.subr.bf16.mxu1 %v1305_v7 }
  0x44   :  { %1154 = vmatpush3.bf16.msra.mxu0 %v1306_v8 }
  0x45   :  { %1155 = vmatprep.subr.bf16.mxu0 %v1308_v10  ;;  %1176 = vmatpush3.bf16.msra.mxu1 %v1307_v9  ;;  %v1090_v10 = vld [vmem:[%s1503_s6] ss:$0 sm:$0xff] }
  0x46   :  { %1177 = vmatprep.subr.bf16.mxu1 %v1309_v11 }
  0x48   :  { %1156 = vmatpush3.bf16.msra.mxu0 %v1310_v12 }
  0x49   :  { %1157 = vmatprep.subr.bf16.mxu0 %v1312_v14  ;;  %1178 = vmatpush3.bf16.msra.mxu1 %v1311_v13 }
  0x4a   :  { %1179 = vmatprep.subr.bf16.mxu1 %v1313_v15 }
  0x4c   :  { %1158 = vmatpush3.bf16.msra.mxu0 %v1314_v16 }
  0x4d   :  { %1180 = vmatpush3.bf16.msra.mxu1 %v1315_v17  ;;  %1205 = vmatprep.subr.bf16.mxu0 %v1358_v21 }
  0x4e   :  { %1225 = vmatprep.subr.bf16.mxu1 %v1358_v21 }
  0x4f   :  { %732 = vmatmul.mubr.bf16.vlgmr.msra.gmra.mxu0 %v208_v18 }
  0x50   :  { %772 = vmatmul.mubr.bf16.vlgmr.msra.gmra.mxu1 %v224_v19  ;;  %1206 = vmatpush3.bf16.msra.mxu0 %v1316_v20 }
  0x51   :  { %1207 = vmatprep.subr.bf16.mxu0 %v1358_v21  ;;  %1221 = vmatprep.mubr.msk.bf16.mxu0 %vm1359_vm0, %v1358_v21 }
  0x52   :  { %1241 = vmatprep.mubr.msk.bf16.mxu1 %vm1359_vm0, %v1358_v21  ;;  %1226 = vmatpush3.bf16.msra.mxu1 %v1324_v29 }
  0x53   :  { %1227 = vmatprep.subr.bf16.mxu1 %v1358_v21 }
  0x54   :  { %1208 = vmatpush3.bf16.msra.mxu0 %v1317_v22 }
  0x55   :  { %1209 = vmatprep.subr.bf16.mxu0 %v1358_v21 }
  0x56   :  { %1228 = vmatpush3.bf16.msra.mxu1 %v1325_v30 }
  0x57   :  { %1229 = vmatprep.subr.bf16.mxu1 %v1358_v21 }
  0x58   :  { %1210 = vmatpush3.bf16.msra.mxu0 %v1318_v23 }
  0x59   :  { %1211 = vmatprep.subr.bf16.mxu0 %v1358_v21 }
  0x5a   :  { %1230 = vmatpush3.bf16.msra.mxu1 %v1326_v31 }
  0x5b   :  { %1231 = vmatprep.subr.bf16.mxu1 %v1358_v21 }
  0x5c   :  { %1212 = vmatpush3.bf16.msra.mxu0 %v1319_v24 }
  0x5d   :  { %1213 = vmatprep.subr.bf16.mxu0 %v1358_v21 }
  0x5e   :  { %1232 = vmatpush3.bf16.msra.mxu1 %v1327_v32 }
  0x5f   :  { %1233 = vmatprep.subr.bf16.mxu1 %v1358_v21 }
  0x60   :  { %1214 = vmatpush3.bf16.msra.mxu0 %v1320_v25 }
  0x61   :  { %1215 = vmatprep.subr.bf16.mxu0 %v1358_v21 }
  0x62   :  { %1234 = vmatpush3.bf16.msra.mxu1 %v1328_v33 }
  0x63   :  { %1235 = vmatprep.subr.bf16.mxu1 %v1358_v21 }
  0x64   :  { %1216 = vmatpush3.bf16.msra.mxu0 %v1321_v26 }
  0x65   :  { %1217 = vmatprep.subr.bf16.mxu0 %v1358_v21 }
  0x66   :  { %1236 = vmatpush3.bf16.msra.mxu1 %v1329_v34 }
  0x67   :  { %1237 = vmatprep.subr.bf16.mxu1 %v1358_v21 }
  0x68   :  { %1218 = vmatpush3.bf16.msra.mxu0 %v1322_v27 }
  0x69   :  { %1219 = vmatprep.subr.bf16.mxu0 %v1358_v21 }
  0x6a   :  { %1238 = vmatpush3.bf16.msra.mxu1 %v1330_v63 }
  0x6b   :  { %1239 = vmatprep.subr.bf16.mxu1 %v1358_v21 }
  0x6c   :  { %1220 = vmatpush3.bf16.msra.mxu0 %v1323_v28 }
  0x6e   :  { %1240 = vmatpush3.bf16.msra.mxu1 %v1331_v0 }
  0xef   :  { %v1115_v35 = vpop.f32.mrf.mxu0 }
  0xf0   :  { %v1137_v36 = vpop.f32.mrf.mxu1 }
  0xf1   :  { %v1116_v37 = vpop.f32.mrf.mxu0 }
  0xf2   :  { %v1138_v38 = vpop.f32.mrf.mxu1  ;;  %v1117_v43 = vadd.f32 %v1116_v37, %v1115_v35 }
  0xf3   :  { %v1118_v39 = vpop.f32.mrf.mxu0  ;;  %v1139_v46 = vadd.f32 %v1138_v38, %v1137_v36 }
  0xf4   :  { %v1140_v40 = vpop.f32.mrf.mxu1  ;;  %v654_v45 = vadd.f32 %v1117_v43, %v1016_v44 }
  0xf5   :  { %v1119_v41 = vpop.f32.mrf.mxu0 }
  0xf6   :  { %v1141_v42 = vpop.f32.mrf.mxu1  ;;  %v694_v50 = vadd.f32 %v1139_v46, %v654_v45 }
 0x10f   :  { %v1159_v47 = vpop.f32.mrf.mxu0 }
 0x110   :  { %v1181_v48 = vpop.f32.mrf.mxu1 }
 0x111   :  { %v1160_v49 = vpop.f32.mrf.mxu0 }
 0x112   :  { %v1161_v51 = vadd.f32 %v1160_v49, %v1159_v47  ;;  %v1182_v52 = vpop.f32.mrf.mxu1 }
 0x113   :  { %v1162_v53 = vpop.f32.mrf.mxu0  ;;  %v1183_v55 = vadd.f32 %v1182_v52, %v1181_v48 }
 0x114   :  { %v734_v54 = vadd.f32 %v1161_v51, %v694_v50  ;;  %v1184_v56 = vpop.f32.mrf.mxu1 }
 0x115   :  { %v1163_v57 = vpop.f32.mrf.mxu0 }
 0x116   :  { %v774_v58 = vadd.f32 %v1183_v55, %v734_v54  ;;  %v1185_v59 = vpop.f32.mrf.mxu1 }
 0x118   :  { %vm779_vm1 = vcmp.gt.f32.partialorder %v774_v58, 0.0  ;;  %v780_v60 = vmul.f32 0.2, %v774_v58 }
 0x11a   :  { %v781_v61 = vsel %vm779_vm1, %v774_v58, %v780_v60 }
 0x11b   :  { %v782_v62 = vpack.c.bf16 %v781_v61, %v781_v61 }
 0x11d   :  { %1222 = vmatmul.mubr.bf16.vlgmr.msra.gmra.mxu0 %v782_v62 }
 0x1dd   :  { %v888_v2 = vpop.f32.mrf.mxu0 }
 0x1de   :  { %v889_v3 = vadd.f32 %v1081_v1, %v888_v2 }
 0x1df   :  { %v1223_v4 = vpop.f32.mrf.mxu0 }
 0x1e0   :  { %vm894_vm2 = vcmp.gt.f32.partialorder %v889_v3, 0.0  ;;  %v895_v5 = vmul.f32 0.2, %v889_v3 }
 0x1e1   :  { %v891_v6 = vpop.f32.mrf.mxu0 }
 0x1e2   :  { %v896_v7 = vsel %vm894_vm2, %v889_v3, %v895_v5 }
 0x1e3   :  { %v897_v8 = vpack.c.bf16 %v896_v7, %v896_v7  ;;  %v1224_v9 = vpop.f32.mrf.mxu0 }
 0x1e5   :  { %1242 = vmatmul.mubr.bf16.vlgmr.msra.gmra.mxu1 %v897_v8 }
 0x2a5   :  { %v1003_v11 = vpop.f32.mrf.mxu1 }
 0x2a6   :  { %v1004_v12 = vadd.f32 %v1090_v10, %v1003_v11 }
 0x2a7   :  { %v1243_v13 = vpop.f32.mrf.mxu1 }
 0x2a8   :  { %v1009_v14 = vpack.c.bf16 %v1004_v12, %v1004_v12 }
 0x2a9   :  { %v1006_v15 = vpop.f32.mrf.mxu1 }
 0x2aa   :  { %1010 = vst [vmem:[%s1504_s7] sm:$0x1] %v1009_v14 }
 0x2ab   :  { %v1244_v16 = vpop.f32.mrf.mxu1 }
 0x2ac   :  { %1015 = vsyncpa [#allocation3], 1 }

</bundles_post_ra>
